<compile_context>
chip_gen: v7x
topology: tpu7x:2x2x1
jax: 0.10.0
libtpu: 0.0.40
codegen_flags: <defaults>
</compile_context>

<pallas_src>
import jax
import jax.numpy as jnp
from jax.experimental import pallas as pl
from jax.experimental.pallas import tpu as pltpu

INPUT_DIM = 1   # module spec hard-codes input_dim = 1
H1 = 64
H2 = 32
OUT = 1

_H1F = 2 * H1   # 128 fused hidden-1 width (full vreg lane width)
_H2F = 2 * H2   # 64  fused hidden-2 width


def _ae_kernel(x_ref, w1_ref, b1_ref, w2t_ref, b2_ref, w3_ref,
               bb3_ref, mb3_ref, out_ref):
    # x_ref: (1, T)  batch on lanes
    x = x_ref[...]

    # ---- layer 1: (128,1) * (1,T) + (128,1) -> (128,T)   [VPU outer product]
    h1 = jnp.maximum(w1_ref[...] * x + b1_ref[...], 0.0)

    # ---- layer 2: (64,128) @ (128,T) -> (64,T)            [MXU, K=128]
    h2 = jnp.dot(w2t_ref[...], h1, preferred_element_type=jnp.float32)
    h2 = jnp.maximum(h2 + b2_ref[...], 0.0)

    # ---- layer 3: per-head dot as VPU mul + XLU sublane reduce
    prod = h2 * w3_ref[...]                                     # (64, T)
    z_beta = jnp.sum(prod[:H2, :], axis=0, keepdims=True) + bb3_ref[...]  # (1,T)
    z_mu = jnp.sum(prod[H2:, :], axis=0, keepdims=True) + mb3_ref[...]    # (1,T)

    recon = z_beta * x + z_mu                                   # (1, T)

    # lane-dense stores into the (3, T) output slab
    out_ref[0:1, :] = recon
    out_ref[1:2, :] = z_beta
    out_ref[2:3, :] = z_mu


def _round_up(n, m):
    return ((n + m - 1) // m) * m


def _pack_params(p):
    """Fuse beta/mu encoders into one MLP (runs once, outside the kernel)."""
    w1 = jnp.concatenate([p["bw1"], p["mw1"]], axis=1).reshape(_H1F, 1)
    b1 = jnp.concatenate([p["bb1"], p["mb1"]], axis=1).reshape(_H1F, 1)

    w2t = jnp.zeros((_H2F, _H1F), jnp.float32)
    w2t = w2t.at[:H2, :H1].set(p["bw2"].T)
    w2t = w2t.at[H2:, H1:].set(p["mw2"].T)
    b2 = jnp.concatenate([p["bb2"], p["mb2"]], axis=1).reshape(_H2F, 1)

    w3 = jnp.concatenate([p["bw3"], p["mw3"]], axis=0)          # (64, 1)
    bb3 = p["bb3"].reshape(1, 1)
    mb3 = p["mb3"].reshape(1, 1)
    return w1, b1, w2t, b2, w3, bb3, mb3


def autoencoder_forward(x, params, tile_b=2048):
    """x: (B, 1) f32.  Returns (recon_y, z_beta, z_mu), each (B, 1) f32."""
    assert x.shape[1] == INPUT_DIM
    B = x.shape[0]

    tile_b = min(tile_b, _round_up(max(B, 1), 128))
    B_pad = _round_up(B, tile_b)

    # layout flip: batch on the lane axis, zero-padded to a tile multiple
    x_row = jnp.zeros((1, B_pad), jnp.float32).at[0, :B].set(x[:, 0])

    w1, b1, w2t, b2, w3, bb3, mb3 = _pack_params(params)

    const2 = lambda i: (0, 0)   # weights: same block every step -> stay resident
    batch2 = lambda i: (0, i)

    out = pl.pallas_call(
        _ae_kernel,
        out_shape=jax.ShapeDtypeStruct((3, B_pad), jnp.float32),
        grid=(B_pad // tile_b,),
        in_specs=[
            pl.BlockSpec((1, tile_b), batch2),       # x
            pl.BlockSpec((_H1F, 1), const2),         # w1 column
            pl.BlockSpec((_H1F, 1), const2),         # b1 column
            pl.BlockSpec((_H2F, _H1F), const2),      # W2^T block-diag
            pl.BlockSpec((_H2F, 1), const2),         # b2 column
            pl.BlockSpec((_H2F, 1), const2),         # w3 column
            pl.BlockSpec((1, 1), const2),            # bb3
            pl.BlockSpec((1, 1), const2),            # mb3
        ],
        out_specs=pl.BlockSpec((3, tile_b), batch2),
        compiler_params=pltpu.CompilerParams(
            dimension_semantics=("parallel",),
        ),
    )(x_row, w1, b1, w2t, b2, w3, bb3, mb3)

    recon = out[0, :B].reshape(B, OUT)
    z_beta = out[1, :B].reshape(B, OUT)
    z_mu = out[2, :B].reshape(B, OUT)
    return recon, z_beta, z_mu


def init_params(key):
    """Deterministic init mimicking nn.Linear's U(-1/sqrt(fan_in), 1/sqrt(fan_in)).
    Weights stored as (in_features, out_features), biases as (1, out_features)."""
    def linear(key, fan_in, fan_out):
        kw, kb = jax.random.split(key)
        bound = 1.0 / jnp.sqrt(jnp.float32(fan_in))
        w = jax.random.uniform(kw, (fan_in, fan_out), jnp.float32, -bound, bound)
        b = jax.random.uniform(kb, (1, fan_out), jnp.float32, -bound, bound)
        return w, b

    keys = jax.random.split(key, 6)
    bw1, bb1 = linear(keys[0], INPUT_DIM, H1)
    bw2, bb2 = linear(keys[1], H1, H2)
    bw3, bb3 = linear(keys[2], H2, OUT)
    mw1, mb1 = linear(keys[3], INPUT_DIM, H1)
    mw2, mb2 = linear(keys[4], H1, H2)
    mw3, mb3 = linear(keys[5], H2, OUT)
    return dict(bw1=bw1, bb1=bb1, bw2=bw2, bb2=bb2, bw3=bw3, bb3=bb3,
                mw1=mw1, mb1=mb1, mw2=mw2, mb2=mb2, mw3=mw3, mb3=mb3)


def _reference_forward(x, p):
    def mlp(w1, b1, w2, b2, w3, b3):
        h = jnp.maximum(x @ w1 + b1, 0.0)
        h = jnp.maximum(h @ w2 + b2, 0.0)
        return h @ w3 + b3
    z_beta = mlp(p["bw1"], p["bb1"], p["bw2"], p["bb2"], p["bw3"], p["bb3"])
    z_mu = mlp(p["mw1"], p["mb1"], p["mw2"], p["mb2"], p["mw3"], p["mb3"])
    return z_beta * x + z_mu, z_beta, z_mu


if __name__ == "__main__":
    key = jax.random.PRNGKey(0)
    kx, kp = jax.random.split(key)

    B = 8
    x = jax.random.normal(kx, (B, INPUT_DIM), jnp.float32)
    params = init_params(kp)

    recon_y, z_beta, z_mu = autoencoder_forward(x, params)
    jax.block_until_ready((recon_y, z_beta, z_mu))

    # cross-check against a plain-JAX reference (unfused layout)
    ref_recon, ref_beta, ref_mu = _reference_forward(x, params)
    assert jnp.allclose(recon_y, ref_recon, atol=1e-5, rtol=1e-4)
    assert jnp.allclose(z_beta, ref_beta, atol=1e-5, rtol=1e-4)
    assert jnp.allclose(z_mu, ref_mu, atol=1e-5, rtol=1e-4)

    print("KERNEL_OK")
</pallas_src>

<mosaic_0001>
module attributes {stable_mosaic.version = 11 : i64} {
  func.func @_ae_kernel(%arg0: i32, %arg1: memref<1x128xf32, #tpu.memory_space<vmem>>, %arg2: memref<128x1xf32, #tpu.memory_space<vmem>>, %arg3: memref<128x1xf32, #tpu.memory_space<vmem>>, %arg4: memref<64x128xf32, #tpu.memory_space<vmem>>, %arg5: memref<64x1xf32, #tpu.memory_space<vmem>>, %arg6: memref<64x1xf32, #tpu.memory_space<vmem>>, %arg7: memref<1x1xf32, #tpu.memory_space<vmem>>, %arg8: memref<1x1xf32, #tpu.memory_space<vmem>>, %arg9: memref<3x128xf32, #tpu.memory_space<vmem>>) attributes {dimension_semantics = [#tpu.dimension_semantics<parallel>], iteration_bounds = array<i64: 1>, scalar_prefetch = 0 : i64, scratch_operands = 0 : i64, tpu.core_type = #tpu.core_type<tc>, window_params = [{transform_indices = @transform_0, window_bounds = array<i64: 1, 128>}, {pipeline_mode = #tpu.pipeline_mode<synchronous>, transform_indices = @transform_1, window_bounds = array<i64: 128, 1>}, {pipeline_mode = #tpu.pipeline_mode<synchronous>, transform_indices = @transform_2, window_bounds = array<i64: 128, 1>}, {pipeline_mode = #tpu.pipeline_mode<synchronous>, transform_indices = @transform_3, window_bounds = array<i64: 64, 128>}, {pipeline_mode = #tpu.pipeline_mode<synchronous>, transform_indices = @transform_4, window_bounds = array<i64: 64, 1>}, {pipeline_mode = #tpu.pipeline_mode<synchronous>, transform_indices = @transform_5, window_bounds = array<i64: 64, 1>}, {pipeline_mode = #tpu.pipeline_mode<synchronous>, transform_indices = @transform_6, window_bounds = array<i64: 1, 1>}, {pipeline_mode = #tpu.pipeline_mode<synchronous>, transform_indices = @transform_7, window_bounds = array<i64: 1, 1>}, {transform_indices = @transform_8, window_bounds = array<i64: 3, 128>}]} {
    %c0 = arith.constant 0 : index
    %c0_0 = arith.constant 0 : index
    %0 = vector.load %arg1[%c0, %c0_0] : memref<1x128xf32, #tpu.memory_space<vmem>>, vector<1x128xf32>
    %c0_1 = arith.constant 0 : index
    %c0_2 = arith.constant 0 : index
    %1 = vector.load %arg2[%c0_1, %c0_2] : memref<128x1xf32, #tpu.memory_space<vmem>>, vector<128x1xf32>
    %2 = vector.broadcast %1 : vector<128x1xf32> to vector<128x128xf32>
    %3 = vector.broadcast %0 : vector<1x128xf32> to vector<128x128xf32>
    %4 = arith.mulf %2, %3 : vector<128x128xf32>
    %c0_3 = arith.constant 0 : index
    %c0_4 = arith.constant 0 : index
    %5 = vector.load %arg3[%c0_3, %c0_4] : memref<128x1xf32, #tpu.memory_space<vmem>>, vector<128x1xf32>
    %6 = vector.broadcast %5 : vector<128x1xf32> to vector<128x128xf32>
    %7 = arith.addf %4, %6 : vector<128x128xf32>
    %cst = arith.constant 0.000000e+00 : f32
    %8 = vector.broadcast %cst : f32 to vector<128x128xf32>
    %9 = arith.maximumf %7, %8 : vector<128x128xf32>
    %c0_5 = arith.constant 0 : index
    %c0_6 = arith.constant 0 : index
    %10 = vector.load %arg4[%c0_5, %c0_6] : memref<64x128xf32, #tpu.memory_space<vmem>>, vector<64x128xf32>
    %cst_7 = arith.constant dense<0.000000e+00> : vector<64x128xf32>
    %11 = tpu.matmul %10, %9, %cst_7 {dimension_numbers = #tpu.dot_dimension_numbers<[1], [0], [0], [1], [0, 0, 1, 1], [], []>} : vector<64x128xf32>, vector<128x128xf32>, vector<64x128xf32> -> vector<64x128xf32>
    %c0_8 = arith.constant 0 : index
    %c0_9 = arith.constant 0 : index
    %12 = vector.load %arg5[%c0_8, %c0_9] : memref<64x1xf32, #tpu.memory_space<vmem>>, vector<64x1xf32>
    %13 = vector.broadcast %12 : vector<64x1xf32> to vector<64x128xf32>
    %14 = arith.addf %11, %13 : vector<64x128xf32>
    %cst_10 = arith.constant 0.000000e+00 : f32
    %15 = vector.broadcast %cst_10 : f32 to vector<64x128xf32>
    %16 = arith.maximumf %14, %15 : vector<64x128xf32>
    %c0_11 = arith.constant 0 : index
    %c0_12 = arith.constant 0 : index
    %17 = vector.load %arg6[%c0_11, %c0_12] : memref<64x1xf32, #tpu.memory_space<vmem>>, vector<64x1xf32>
    %18 = vector.broadcast %17 : vector<64x1xf32> to vector<64x128xf32>
    %19 = arith.mulf %16, %18 : vector<64x128xf32>
    %20 = vector.extract_strided_slice %19 {offsets = [0, 0], sizes = [32, 128], strides = [1, 1]} : vector<64x128xf32> to vector<32x128xf32>
    %cst_13 = arith.constant dense<0.000000e+00> : vector<128xf32>
    %21 = vector.multi_reduction <add>, %20, %cst_13 [0] : vector<32x128xf32> to vector<128xf32>
    %22 = vector.shape_cast %21 : vector<128xf32> to vector<1x128xf32>
    %c0_14 = arith.constant 0 : index
    %c0_15 = arith.constant 0 : index
    %23 = vector.load %arg7[%c0_14, %c0_15] : memref<1x1xf32, #tpu.memory_space<vmem>>, vector<1x1xf32>
    %24 = vector.broadcast %23 : vector<1x1xf32> to vector<1x128xf32>
    %25 = arith.addf %22, %24 : vector<1x128xf32>
    %26 = vector.extract_strided_slice %19 {offsets = [32, 0], sizes = [32, 128], strides = [1, 1]} : vector<64x128xf32> to vector<32x128xf32>
    %cst_16 = arith.constant dense<0.000000e+00> : vector<128xf32>
    %27 = vector.multi_reduction <add>, %26, %cst_16 [0] : vector<32x128xf32> to vector<128xf32>
    %28 = vector.shape_cast %27 : vector<128xf32> to vector<1x128xf32>
    %c0_17 = arith.constant 0 : index
    %c0_18 = arith.constant 0 : index
    %29 = vector.load %arg8[%c0_17, %c0_18] : memref<1x1xf32, #tpu.memory_space<vmem>>, vector<1x1xf32>
    %30 = vector.broadcast %29 : vector<1x1xf32> to vector<1x128xf32>
    %31 = arith.addf %28, %30 : vector<1x128xf32>
    %32 = arith.mulf %25, %0 : vector<1x128xf32>
    %33 = arith.addf %32, %31 : vector<1x128xf32>
    %c0_19 = arith.constant 0 : index
    %c0_20 = arith.constant 0 : index
    %34 = vector.load %arg9[%c0_19, %c0_20] : memref<3x128xf32, #tpu.memory_space<vmem>>, vector<1x128xf32>
    tpu.vector_store %arg9[%c0_19, %c0_20], %33 {strides = array<i32>} : memref<3x128xf32, #tpu.memory_space<vmem>>, vector<1x128xf32>,
    %c1 = arith.constant 1 : index
    %c0_21 = arith.constant 0 : index
    %35 = vector.load %arg9[%c1, %c0_21] : memref<3x128xf32, #tpu.memory_space<vmem>>, vector<1x128xf32>
    tpu.vector_store %arg9[%c1, %c0_21], %25 {strides = array<i32>} : memref<3x128xf32, #tpu.memory_space<vmem>>, vector<1x128xf32>,
    %c2 = arith.constant 2 : index
    %c0_22 = arith.constant 0 : index
    %36 = vector.load %arg9[%c2, %c0_22] : memref<3x128xf32, #tpu.memory_space<vmem>>, vector<1x128xf32>
    tpu.vector_store %arg9[%c2, %c0_22], %31 {strides = array<i32>} : memref<3x128xf32, #tpu.memory_space<vmem>>, vector<1x128xf32>,
    return
  }
  func.func @transform_0(%arg0: i32) -> (i32, i32) {
    %c0_i32 = arith.constant 0 : i32
    %c0_i32_0 = arith.constant 0 : i32
    return %c0_i32, %arg0 : i32, i32
  }
  func.func @transform_1(%arg0: i32) -> (i32, i32) {
    %c0_i32 = arith.constant 0 : i32
    %c0_i32_0 = arith.constant 0 : i32
    %c0_i32_1 = arith.constant 0 : i32
    return %c0_i32, %c0_i32_0 : i32, i32
  }
  func.func @transform_2(%arg0: i32) -> (i32, i32) {
    %c0_i32 = arith.constant 0 : i32
    %c0_i32_0 = arith.constant 0 : i32
    %c0_i32_1 = arith.constant 0 : i32
    return %c0_i32, %c0_i32_0 : i32, i32
  }
  func.func @transform_3(%arg0: i32) -> (i32, i32) {
    %c0_i32 = arith.constant 0 : i32
    %c0_i32_0 = arith.constant 0 : i32
    %c0_i32_1 = arith.constant 0 : i32
    return %c0_i32, %c0_i32_0 : i32, i32
  }
  func.func @transform_4(%arg0: i32) -> (i32, i32) {
    %c0_i32 = arith.constant 0 : i32
    %c0_i32_0 = arith.constant 0 : i32
    %c0_i32_1 = arith.constant 0 : i32
    return %c0_i32, %c0_i32_0 : i32, i32
  }
  func.func @transform_5(%arg0: i32) -> (i32, i32) {
    %c0_i32 = arith.constant 0 : i32
    %c0_i32_0 = arith.constant 0 : i32
    %c0_i32_1 = arith.constant 0 : i32
    return %c0_i32, %c0_i32_0 : i32, i32
  }
  func.func @transform_6(%arg0: i32) -> (i32, i32) {
    %c0_i32 = arith.constant 0 : i32
    %c0_i32_0 = arith.constant 0 : i32
    %c0_i32_1 = arith.constant 0 : i32
    return %c0_i32, %c0_i32_0 : i32, i32
  }
  func.func @transform_7(%arg0: i32) -> (i32, i32) {
    %c0_i32 = arith.constant 0 : i32
    %c0_i32_0 = arith.constant 0 : i32
    %c0_i32_1 = arith.constant 0 : i32
    return %c0_i32, %c0_i32_0 : i32, i32
  }
  func.func @transform_8(%arg0: i32) -> (i32, i32) {
    %c0_i32 = arith.constant 0 : i32
    %c0_i32_0 = arith.constant 0 : i32
    return %c0_i32, %arg0 : i32, i32
  }
}

</mosaic_0001>

<bundles_post_ra>
// kernel: tpu_custom_call.1
= control target key start
LH: loop header
LB: loop body
LE: loop exit
PB: predicated region body
PF: predicated region fallthrough
CT: control target
= control target key end

     0   :  { %s972_s0 = inlined_call_operand.vmem [shape: f32[1,128], index: 0, kind: input, shape index: {}]   ;;  %s973_s1 = inlined_call_operand.vmem [shape: f32[128,1], index: 1, kind: input, shape index: {}]   ;;  %s974_s2 = inlined_call_operand.vmem [shape: f32[128,1], index: 2, kind: input, shape index: {}]   ;;  %s975_s3 = inlined_call_operand.vmem [shape: f32[64,128], index: 3, kind: input, shape index: {}]   ;;  %s976_s4 = inlined_call_operand.vmem [shape: f32[64,1], index: 4, kind: input, shape index: {}]   ;;  %s977_s5 = inlined_call_operand.vmem [shape: f32[64,1], index: 5, kind: input, shape index: {}]   ;;  %s978_s6 = inlined_call_operand.<no memory space> [shape: f32[1,1], index: 6, kind: input, shape index: {}]   ;;  %s979_s8 = inlined_call_operand.hbm [shape: f32[3,128], index: 8, kind: output, shape index: {}]   ;;  %s980_s7 = inlined_call_operand.<no memory space> [shape: f32[1,1], index: 7, kind: input, shape index: {}]  }
   0x1   :  { %v13_v0 = vstv %s978_s6  ;;  %v15_v1 = vstv %s980_s7 }
   0x2   :  { %14 = vst [vmem:[#allocation2] sm:$0x1] %v13_v0  ;;  %16 = vst [vmem:[#allocation3] sm:$0x1] %v15_v1 }
   0x3   :  { %v153_v2 = vld [vmem:[%s974_s2] sm:$0xff]  ;;  %v709_v4 = vmov 0   ;;  %v154_v5 = vld [vmem:[%s974_s2 + $0x8] sm:$0xff]  ;;  %v38_v7 = vld [vmem:[%s973_s1 + $0x18] sm:$0xff] }
   0x4   :  { %v35_v3 = vld [vmem:[%s973_s1] sm:$0xff]  ;;  %684 = vset.pattern.permute.xlu1 %v709_v4  ;;  %683 = vset.pattern.permute.xlu0 %v709_v4  ;;  %v36_v6 = vld [vmem:[%s973_s1 + $0x8] sm:$0xff]  ;;  %v37_v8 = vld [vmem:[%s973_s1 + $0x10] sm:$0xff] }
   0x5   :  { %171 = vperm.xlu1 %684, %v153_v2   ;;  %53 = vperm.xlu0 %683, %v35_v3   ;;  %v156_v9 = vld [vmem:[%s974_s2 + $0x18] sm:$0xff]  ;;  %v155_v10 = vld [vmem:[%s974_s2 + $0x10] sm:$0xff]  ;;  %v40_v11 = vld [vmem:[%s973_s1 + $0x28] sm:$0xff] }
   0x6   :  { %v39_v12 = vld [vmem:[%s973_s1 + $0x20] sm:$0xff] }
   0x9   :  { %176 = vperm.xlu1 %684, %v154_v5   ;;  %58 = vperm.xlu0 %683, %v36_v6  }
   0xd   :  { %68 = vperm.xlu1 %684, %v38_v7   ;;  %63 = vperm.xlu0 %683, %v37_v8  }
  0x11   :  { %186 = vperm.xlu1 %684, %v156_v9   ;;  %181 = vperm.xlu0 %683, %v155_v10  }
  0x12   :  { %17 = vsyncpa [#allocation5], 0  ;;  %v158_v13 = vld [vmem:[%s974_s2 + $0x28] sm:$0xff]  ;;  %v157_v14 = vld [vmem:[%s974_s2 + $0x20] sm:$0xff]  ;;  %v132_v55 = vlaneseq }
  0x13   :  { %v42_v15 = vld [vmem:[%s973_s1 + $0x38] sm:$0xff]  ;;  %v41_v16 = vld [vmem:[%s973_s1 + $0x30] sm:$0xff]  ;;  %v44_v19 = vld [vmem:[%s973_s1 + $0x48] sm:$0xff] }
  0x14   :  { %v160_v17 = vld [vmem:[%s974_s2 + $0x38] sm:$0xff]  ;;  %v159_v18 = vld [vmem:[%s974_s2 + $0x30] sm:$0xff]  ;;  %v43_v20 = vld [vmem:[%s973_s1 + $0x40] sm:$0xff]  ;;  %v133_v56 = vshrl.u32 %v132_v55, 7 }
  0x15   :  { %78 = vperm.xlu1 %684, %v40_v11   ;;  %73 = vperm.xlu0 %683, %v39_v12   ;;  %v162_v21 = vld [vmem:[%s974_s2 + $0x48] sm:$0xff]  ;;  %v161_v22 = vld [vmem:[%s974_s2 + $0x40] sm:$0xff]  ;;  %v46_v23 = vld [vmem:[%s973_s1 + $0x58] sm:$0xff] }
  0x16   :  { %v45_v24 = vld [vmem:[%s973_s1 + $0x50] sm:$0xff]  ;;  %v164_v25 = vld [vmem:[%s974_s2 + $0x58] sm:$0xff]  ;;  %v48_v27 = vld [vmem:[%s973_s1 + $0x68] sm:$0xff]  ;;  %v912_v57 = vsub.s32 0, %v133_v56 }
  0x17   :  { %v163_v26 = vld [vmem:[%s974_s2 + $0x50] sm:$0xff]  ;;  %v47_v28 = vld [vmem:[%s973_s1 + $0x60] sm:$0xff]  ;;  %v166_v29 = vld [vmem:[%s974_s2 + $0x68] sm:$0xff] }
  0x18   :  { %v165_v30 = vld [vmem:[%s974_s2 + $0x60] sm:$0xff]  ;;  %v50_v31 = vld [vmem:[%s973_s1 + $0x78] sm:$0xff]  ;;  %v49_v32 = vld [vmem:[%s973_s1 + $0x70] sm:$0xff] }
  0x19   :  { %196 = vperm.xlu1 %684, %v158_v13   ;;  %191 = vperm.xlu0 %683, %v157_v14   ;;  %v168_v33 = vld [vmem:[%s974_s2 + $0x78] sm:$0xff]  ;;  %v167_v34 = vld [vmem:[%s974_s2 + $0x70] sm:$0xff]  ;;  %v290_v35 = vld [vmem:[%s976_s4 + $0x8] sm:$0xff] }
  0x1a   :  { %v289_v36 = vld [vmem:[%s976_s4] sm:$0xff]  ;;  %v291_v38 = vld [vmem:[%s976_s4 + $0x10] sm:$0xff]  ;;  %v292_v41 = vld [vmem:[%s976_s4 + $0x18] sm:$0xff] }
  0x1b   :  { %v293_v37 = vld [vmem:[%s976_s4 + $0x20] sm:$0xff]  ;;  %v294_v42 = vld [vmem:[%s976_s4 + $0x28] sm:$0xff]  ;;  %v295_v44 = vld [vmem:[%s976_s4 + $0x30] sm:$0xff] }
  0x1c   :  { %v281_v39 = vld [vmem:[%s975_s3] sm:$0xff]  ;;  %v296_v45 = vld [vmem:[%s976_s4 + $0x38] sm:$0xff]  ;;  %v451_v46 = vld [vmem:[%s977_s5 + $0x8] sm:$0xff] }
  0x1d   :  { %88 = vperm.xlu1 %684, %v42_v15   ;;  %83 = vperm.xlu0 %683, %v41_v16   ;;  %v285_v40 = vld [vmem:[%s975_s3 + $0x20] sm:$0xff]  ;;  %v452_v48 = vld [vmem:[%s977_s5 + $0x10] sm:$0xff]  ;;  %v453_v49 = vld [vmem:[%s977_s5 + $0x18] sm:$0xff] }
  0x1e   :  { %621 = vmatprep.mubr.f32.mxu0 %v281_v39  ;;  %627 = vmatprep.mubr.f32.mxu1 %v285_v40  ;;  %v450_v43 = vld [vmem:[%s977_s5] sm:$0xff]  ;;  %v455_v50 = vld [vmem:[%s977_s5 + $0x28] sm:$0xff]  ;;  %v457_v51 = vld [vmem:[%s977_s5 + $0x38] sm:$0xff] }
  0x1f   :  { %v454_v47 = vld [vmem:[%s977_s5 + $0x20] sm:$0xff]  ;;  %v456_v52 = vld [vmem:[%s977_s5 + $0x30] sm:$0xff] }
  0x20   :  { %v535_v53 = vld [vmem:[#allocation3] sm:$0x1]  ;;  %v515_v54 = vld [vmem:[#allocation2] sm:$0x1] }
  0x21   :  { %206 = vperm.xlu1 %684, %v160_v17   ;;  %201 = vperm.xlu0 %683, %v159_v18   ;;  %v917_v58 = vld [vmem:[%s972_s0] sm:$0x1] }
  0x22   :  { %v921_v59 = vrot.slane %v917_v58, %v912_v57 }
  0x25   :  { %98 = vperm.xlu1 %684, %v44_v19   ;;  %93 = vperm.xlu0 %683, %v43_v20  }
  0x29   :  { %216 = vperm.xlu1 %684, %v162_v21   ;;  %211 = vperm.xlu0 %683, %v161_v22  }
  0x2d   :  { %108 = vperm.xlu1 %684, %v46_v23   ;;  %103 = vperm.xlu0 %683, %v45_v24  }
  0x31   :  { %226 = vperm.xlu1 %684, %v164_v25   ;;  %221 = vperm.xlu0 %683, %v163_v26  }
  0x35   :  { %118 = vperm.xlu1 %684, %v48_v27   ;;  %113 = vperm.xlu0 %683, %v47_v28  }
  0x39   :  { %236 = vperm.xlu1 %684, %v166_v29   ;;  %231 = vperm.xlu0 %683, %v165_v30  }
  0x3d   :  { %128 = vperm.xlu1 %684, %v50_v31   ;;  %123 = vperm.xlu0 %683, %v49_v32  }
  0x41   :  { %246 = vperm.xlu1 %684, %v168_v33   ;;  %241 = vperm.xlu0 %683, %v167_v34  }
  0x45   :  { %304 = vperm.xlu1 %684, %v290_v35   ;;  %299 = vperm.xlu0 %683, %v289_v36  }
  0x49   :  { %319 = vperm.xlu1 %684, %v293_v37   ;;  %309 = vperm.xlu0 %683, %v291_v38  }
  0x4d   :  { %314 = vperm.xlu1 %684, %v292_v41   ;;  %324 = vperm.xlu0 %683, %v294_v42  }
  0x51   :  { %460 = vperm.xlu1 %684, %v450_v43   ;;  %329 = vperm.xlu0 %683, %v295_v44  }
  0x55   :  { %334 = vperm.xlu1 %684, %v296_v45   ;;  %465 = vperm.xlu0 %683, %v451_v46  }
  0x59   :  { %480 = vperm.xlu1 %684, %v454_v47   ;;  %470 = vperm.xlu0 %683, %v452_v48  }
  0x5d   :  { %475 = vperm.xlu1 %684, %v453_v49   ;;  %485 = vperm.xlu0 %683, %v455_v50  }
  0x61   :  { %495 = vperm.xlu1 %684, %v457_v51   ;;  %490 = vperm.xlu0 %683, %v456_v52  }
  0x65   :  { %538 = vperm.xlu1 %684, %v535_v53   ;;  %518 = vperm.xlu0 %683, %v515_v54  }
  0x84   :  { %v172_v60 = vpop.permute.xlu1 %171  ;;  %v54_v61 = vpop.permute.xlu0 %53 }
  0x85   :  { %v137_v62 = vmul.f32 %v921_v59, %v54_v61 }
  0x87   :  { %v249_v1 = vadd.f32 %v172_v60, %v137_v62 }
  0x88   :  { %v177_v63 = vpop.permute.xlu1 %176  ;;  %v59_v0 = vpop.permute.xlu0 %58 }
  0x89   :  { %v138_v2 = vmul.f32 %v921_v59, %v59_v0  ;;  %v265_v6 = vmax.f32 %v249_v1, 0.0 }
  0x8b   :  { %v250_v3 = vadd.f32 %v177_v63, %v138_v2 }
  0x8c   :  { %v69_v4 = vpop.permute.xlu1 %68  ;;  %v64_v5 = vpop.permute.xlu0 %63 }
  0x8d   :  { %v266_v7 = vmax.f32 %v250_v3, 0.0  ;;  %v140_v9 = vmul.f32 %v921_v59, %v69_v4  ;;  %v139_v10 = vmul.f32 %v921_v59, %v64_v5 }
  0x8f   :  { %v633_v8 = vpack.c.bf16 %v266_v7, %v265_v6 }
  0x90   :  { %v187_v11 = vpop.permute.xlu1 %186  ;;  %v182_v12 = vpop.permute.xlu0 %181 }
  0x91   :  { %v252_v13 = vadd.f32 %v187_v11, %v140_v9  ;;  %v251_v14 = vadd.f32 %v182_v12, %v139_v10  ;;  %634 = vmatprep.subr.bf16.mxu0 %v633_v8  ;;  %665 = vmatprep.subr.bf16.mxu1 %v633_v8 }
  0x92   :  { %636 = vmatpush3.bf16.msra.mxu0 %v633_v8  ;;  %673 = vmatpush3.bf16.msra.mxu1 %v633_v8 }
  0x93   :  { %v268_v15 = vmax.f32 %v252_v13, 0.0  ;;  %v267_v16 = vmax.f32 %v251_v14, 0.0 }
  0x94   :  { %v79_v17 = vpop.permute.xlu1 %78  ;;  %v74_v18 = vpop.permute.xlu0 %73 }
  0x95   :  { %v637_v19 = vpack.c.bf16 %v268_v15, %v267_v16  ;;  %v142_v20 = vmul.f32 %v921_v59, %v79_v17  ;;  %v141_v21 = vmul.f32 %v921_v59, %v74_v18 }
  0x97   :  { %638 = vmatprep.subr.bf16.mxu0 %v637_v19  ;;  %666 = vmatprep.subr.bf16.mxu1 %v637_v19 }
  0x98   :  { %v197_v22 = vpop.permute.xlu1 %196  ;;  %v192_v23 = vpop.permute.xlu0 %191  ;;  %640 = vmatpush3.bf16.msra.mxu0 %v637_v19  ;;  %674 = vmatpush3.bf16.msra.mxu1 %v637_v19 }
  0x99   :  { %v254_v24 = vadd.f32 %v197_v22, %v142_v20  ;;  %v253_v25 = vadd.f32 %v192_v23, %v141_v21  ;;  %v282_v23 = vld [vmem:[%s975_s3 + $0x8] sm:$0xff] }
  0x9b   :  { %v270_v26 = vmax.f32 %v254_v24, 0.0  ;;  %v269_v27 = vmax.f32 %v253_v25, 0.0  ;;  %v283_v24 = vld [vmem:[%s975_s3 + $0x10] sm:$0xff] }
  0x9c   :  { %v89_v28 = vpop.permute.xlu1 %88  ;;  %v84_v29 = vpop.permute.xlu0 %83  ;;  %v287_v25 = vld [vmem:[%s975_s3 + $0x30] sm:$0xff] }
  0x9d   :  { %v641_v30 = vpack.c.bf16 %v270_v26, %v269_v27  ;;  %v144_v31 = vmul.f32 %v921_v59, %v89_v28  ;;  %v143_v32 = vmul.f32 %v921_v59, %v84_v29  ;;  %v284_v26 = vld [vmem:[%s975_s3 + $0x18] sm:$0xff] }
  0x9e   :  { %v288_v27 = vld [vmem:[%s975_s3 + $0x38] sm:$0xff] }
  0x9f   :  { %642 = vmatprep.subr.bf16.mxu0 %v641_v30  ;;  %667 = vmatprep.subr.bf16.mxu1 %v641_v30 }
  0xa0   :  { %v207_v33 = vpop.permute.xlu1 %206  ;;  %v202_v34 = vpop.permute.xlu0 %201  ;;  %644 = vmatpush3.bf16.msra.mxu0 %v641_v30  ;;  %675 = vmatpush3.bf16.msra.mxu1 %v641_v30 }
  0xa1   :  { %v256_v35 = vadd.f32 %v207_v33, %v144_v31  ;;  %v255_v36 = vadd.f32 %v202_v34, %v143_v32 }
  0xa3   :  { %v272_v37 = vmax.f32 %v256_v35, 0.0  ;;  %v271_v38 = vmax.f32 %v255_v36, 0.0 }
  0xa4   :  { %v99_v39 = vpop.permute.xlu1 %98  ;;  %v94_v40 = vpop.permute.xlu0 %93 }
  0xa5   :  { %v645_v41 = vpack.c.bf16 %v272_v37, %v271_v38  ;;  %v146_v42 = vmul.f32 %v921_v59, %v99_v39  ;;  %v145_v43 = vmul.f32 %v921_v59, %v94_v40 }
  0xa7   :  { %646 = vmatprep.subr.bf16.mxu0 %v645_v41  ;;  %668 = vmatprep.subr.bf16.mxu1 %v645_v41 }
  0xa8   :  { %v217_v44 = vpop.permute.xlu1 %216  ;;  %v212_v45 = vpop.permute.xlu0 %211  ;;  %648 = vmatpush3.bf16.msra.mxu0 %v645_v41  ;;  %676 = vmatpush3.bf16.msra.mxu1 %v645_v41 }
  0xa9   :  { %v258_v46 = vadd.f32 %v217_v44, %v146_v42  ;;  %v257_v47 = vadd.f32 %v212_v45, %v145_v43 }
  0xab   :  { %v274_v48 = vmax.f32 %v258_v46, 0.0  ;;  %v273_v49 = vmax.f32 %v257_v47, 0.0 }
  0xac   :  { %v109_v50 = vpop.permute.xlu1 %108  ;;  %v104_v51 = vpop.permute.xlu0 %103 }
  0xad   :  { %v649_v52 = vpack.c.bf16 %v274_v48, %v273_v49  ;;  %v148_v53 = vmul.f32 %v921_v59, %v109_v50  ;;  %v147_v54 = vmul.f32 %v921_v59, %v104_v51 }
  0xaf   :  { %650 = vmatprep.subr.bf16.mxu0 %v649_v52  ;;  %669 = vmatprep.subr.bf16.mxu1 %v649_v52 }
  0xb0   :  { %v227_v55 = vpop.permute.xlu1 %226  ;;  %v222_v56 = vpop.permute.xlu0 %221  ;;  %652 = vmatpush3.bf16.msra.mxu0 %v649_v52  ;;  %677 = vmatpush3.bf16.msra.mxu1 %v649_v52 }
  0xb1   :  { %v260_v60 = vadd.f32 %v227_v55, %v148_v53  ;;  %v259_v61 = vadd.f32 %v222_v56, %v147_v54 }
  0xb3   :  { %v276_v62 = vmax.f32 %v260_v60, 0.0  ;;  %v275_v63 = vmax.f32 %v259_v61, 0.0 }
  0xb4   :  { %v119_v0 = vpop.permute.xlu1 %118  ;;  %v114_v1 = vpop.permute.xlu0 %113 }
  0xb5   :  { %v653_v2 = vpack.c.bf16 %v276_v62, %v275_v63  ;;  %v150_v3 = vmul.f32 %v921_v59, %v119_v0  ;;  %v149_v4 = vmul.f32 %v921_v59, %v114_v1 }
  0xb7   :  { %654 = vmatprep.subr.bf16.mxu0 %v653_v2  ;;  %670 = vmatprep.subr.bf16.mxu1 %v653_v2 }
  0xb8   :  { %v237_v5 = vpop.permute.xlu1 %236  ;;  %v232_v6 = vpop.permute.xlu0 %231  ;;  %656 = vmatpush3.bf16.msra.mxu0 %v653_v2  ;;  %678 = vmatpush3.bf16.msra.mxu1 %v653_v2 }
  0xb9   :  { %v262_v7 = vadd.f32 %v237_v5, %v150_v3  ;;  %v261_v8 = vadd.f32 %v232_v6, %v149_v4 }
  0xbb   :  { %v278_v9 = vmax.f32 %v262_v7, 0.0  ;;  %v277_v10 = vmax.f32 %v261_v8, 0.0 }
  0xbc   :  { %v129_v11 = vpop.permute.xlu1 %128  ;;  %v124_v12 = vpop.permute.xlu0 %123 }
  0xbd   :  { %v657_v13 = vpack.c.bf16 %v278_v9, %v277_v10  ;;  %v152_v14 = vmul.f32 %v921_v59, %v129_v11  ;;  %v151_v15 = vmul.f32 %v921_v59, %v124_v12  ;;  %v286_v59 = vld [vmem:[%s975_s3 + $0x28] sm:$0xff]  ;;  %s710_s3 = smov [#allocation4]  }
  0xbe   :  { %s557_s18 = sshll.u32 %s710_s3, 4  ;;  %s558_s18 = int_to_ptr.vmem [resolvable:$true] %s557_s18 }
  0xbf   :  { %658 = vmatprep.subr.bf16.mxu0 %v657_v13  ;;  %671 = vmatprep.subr.bf16.mxu1 %v657_v13  ;;  %s685_s19 = scalar_lea.vmem %s558_s18, 64  ;;  %p690_p1 = scmp.lt.s32.totalorder %s558_s18, %s558_s18 }
  0xc0   :  { %v247_v16 = vpop.permute.xlu1 %246  ;;  %v242_v17 = vpop.permute.xlu0 %241  ;;  %660 = vmatpush3.bf16.msra.mxu0 %v657_v13  ;;  %679 = vmatpush3.bf16.msra.mxu1 %v657_v13  ;;  %p686_p0 = scmp.ne.s32.totalorder %s558_s18, %s685_s19  ;;  %p691_p2 = scmp.lt.s32.totalorder %s685_s19, %s685_s19 }
  0xc1   :  { %v264_v18 = vadd.f32 %v247_v16, %v152_v14  ;;  %v263_v19 = vadd.f32 %v242_v17, %v151_v15 }
  0xc2   :  { %p692_p3 = por %p691_p2, %p690_p1 }
  0xc3   :  { %v280_v20 = vmax.f32 %v264_v18, 0.0  ;;  %v279_v21 = vmax.f32 %v263_v19, 0.0 }
  0xc4   :  { %v305_v28 = vpop.permute.xlu1 %304  ;;  %v300_v29 = vpop.permute.xlu0 %299  ;;  %p693_p4 = pnand %p692_p3, %p686_p0 }
  0xc5   :  { %v661_v22 = vpack.c.bf16 %v280_v20, %v279_v21 }
  0xc7   :  { %662 = vmatprep.subr.bf16.mxu0 %v661_v22  ;;  %672 = vmatprep.subr.bf16.mxu1 %v661_v22 }
  0xc8   :  { %664 = vmatpush3.bf16.msra.mxu0 %v661_v22  ;;  %680 = vmatpush3.bf16.msra.mxu1 %v661_v22  ;;  %v320_v30 = vpop.permute.xlu1 %319  ;;  %v310_v31 = vpop.permute.xlu0 %309 }
  0xcb   :  { %622 = vmatmul.mubr.f32.vlgmr.msra.gmra.mrb[0].mxu0 %v282_v23  ;;  %628 = vmatmul.mubr.f32.vlgmr.msra.gmra.mrb[0].mxu1 %v286_v59 }
  0xcc   :  { %624 = vmatprep.mubr.f32.mxu0 %v283_v24  ;;  %630 = vmatprep.mubr.f32.mxu1 %v287_v25  ;;  %v315_v32 = vpop.permute.xlu1 %314  ;;  %v325_v33 = vpop.permute.xlu0 %324 }
  0xcf   :  { %625 = vmatmul.mubr.f32.gmra.mrb[2].mxu0 %v284_v26  ;;  %631 = vmatmul.mubr.f32.gmra.mrb[2].mxu1 %v288_v27 }
  0xd0   :  { %v461_v34 = vpop.permute.xlu1 %460  ;;  %v330_v35 = vpop.permute.xlu0 %329 }
  0xd4   :  { %v335_v36 = vpop.permute.xlu1 %334  ;;  %v466_v37 = vpop.permute.xlu0 %465 }
  0xd8   :  { %v481_v38 = vpop.permute.xlu1 %480  ;;  %v471_v39 = vpop.permute.xlu0 %470 }
  0xdc   :  { %v476_v48 = vpop.permute.xlu1 %475  ;;  %v486_v49 = vpop.permute.xlu0 %485 }
  0xe0   :  { %v491_v11 = vpop.permute.xlu0 %490  ;;  %v496_v14 = vpop.permute.xlu1 %495 }
 0x19e   :  { %v623_v40 = vpop.f32.mrb[0].mxu0  ;;  %v629_v41 = vpop.f32.mrb[0].mxu1 }
 0x19f   :  { %v409_v42 = vadd.f32 %v623_v40, %v305_v28  ;;  %v429_v43 = vadd.f32 %v629_v41, %v325_v33  ;;  %v403_v44 = vpop.f32.mrb[1].mxu0  ;;  %v423_v45 = vpop.f32.mrb[1].mxu1 }
 0x1a0   :  { %v404_v46 = vadd.f32 %v403_v44, %v300_v29  ;;  %v424_v47 = vadd.f32 %v423_v45, %v320_v30  ;;  %v539_v28 = vpop.permute.xlu1 %538  ;;  %v519_v29 = vpop.permute.xlu0 %518 }
 0x1a1   :  { %v443_v50 = vmax.f32 %v409_v42, 0.0  ;;  %v447_v51 = vmax.f32 %v429_v43, 0.0  ;;  %v524_v33 = vrot.slane %v519_v29, %v912_v57 }
 0x1a2   :  { %v442_v52 = vmax.f32 %v404_v46, 0.0  ;;  %v446_v53 = vmax.f32 %v424_v47, 0.0  ;;  %v626_v54 = vpop.f32.mrb[2].mxu0  ;;  %v632_v55 = vpop.f32.mrb[2].mxu1 }
 0x1a3   :  { %v499_v56 = vmul.f32 %v466_v37, %v443_v50  ;;  %v503_v60 = vmul.f32 %v486_v49, %v447_v51  ;;  %v419_v61 = vadd.f32 %v626_v54, %v315_v32  ;;  %v439_v62 = vadd.f32 %v632_v55, %v335_v36  ;;  %v413_v63 = vpop.f32.mrb[3].mxu0  ;;  %v433_v0 = vpop.f32.mrb[3].mxu1 }
 0x1a4   :  { %v498_v1 = vmul.f32 %v461_v34, %v442_v52  ;;  %v502_v2 = vmul.f32 %v481_v38, %v446_v53  ;;  %v414_v3 = vadd.f32 %v413_v63, %v310_v31  ;;  %v434_v4 = vadd.f32 %v433_v0, %v330_v35 }
 0x1a5   :  { %v445_v5 = vmax.f32 %v419_v61, 0.0  ;;  %v449_v6 = vmax.f32 %v439_v62, 0.0  ;;  %v544_v32 = vrot.slane %v539_v28, %v912_v57 }
 0x1a6   :  { %v506_v7 = vadd.f32 %v499_v56, %v498_v1  ;;  %v526_v8 = vadd.f32 %v503_v60, %v502_v2  ;;  %v444_v9 = vmax.f32 %v414_v3, 0.0  ;;  %v448_v10 = vmax.f32 %v434_v4, 0.0 }
 0x1a7   :  { %v501_v15 = vmul.f32 %v476_v48, %v445_v5  ;;  %v505_v16 = vmul.f32 %v496_v14, %v449_v6 }
 0x1a8   :  { %v500_v12 = vmul.f32 %v471_v39, %v444_v9  ;;  %v504_v13 = vmul.f32 %v491_v11, %v448_v10 }
 0x1aa   :  { %v507_v17 = vadd.f32 %v506_v7, %v500_v12  ;;  %v527_v18 = vadd.f32 %v526_v8, %v504_v13 }
 0x1ac   :  { %v508_v19 = vadd.f32 %v507_v17, %v501_v15  ;;  %v528_v20 = vadd.f32 %v527_v18, %v505_v16 }
 0x1ae   :  { %v509_v21 = vrot.slane %v508_v19, 4  ;;  %v529_v22 = vrot.slane %v528_v20, 4 }
 0x1b0   :  { %v510_v23 = vadd.f32 %v509_v21, %v508_v19  ;;  %v530_v59 = vadd.f32 %v529_v22, %v528_v20 }
 0x1b2   :  { %v511_v24 = vrot.slane %v510_v23, 2  ;;  %v531_v25 = vrot.slane %v530_v59, 2 }
 0x1b4   :  { %v512_v26 = vadd.f32 %v511_v24, %v510_v23  ;;  %v532_v27 = vadd.f32 %v531_v25, %v530_v59 }
 0x1b6   :  { %v513_v30 = vrot.slane %v512_v26, 1  ;;  %v533_v31 = vrot.slane %v532_v27, 1 }
 0x1b8   :  { %v514_v34 = vadd.f32 %v513_v30, %v512_v26  ;;  %v534_v35 = vadd.f32 %v533_v31, %v532_v27 }
 0x1ba   :  { %v525_v36 = vadd.f32 %v524_v33, %v514_v34  ;;  %v545_v37 = vadd.f32 %v544_v32, %v534_v35 }
 0x1bc   :  { %v546_v38 = vmul.f32 %v525_v36, %v917_v58  ;;  %549 = vst [vmem:[#allocation4 + $0x1] sm:$0x1] %v525_v36  ;;  %550 = vst [vmem:[#allocation4 + $0x2] sm:$0x1] %v545_v37 }
 0x1be   :  { %v547_v39 = vadd.f32 %v546_v38, %v545_v37 }
 0x1c0   :  { %548 = vst [vmem:[#allocation4] sm:$0x1] %v547_v39 }
 0x1c1   :  { %696 = shalt.err (!%p693_p4)
}
 0x1c2   :  { %s697_s22 = scalar_lea.hbm %s979_s8, 64 }
 0x1c3   :  { %p698_p5 = scmp.ne.s32.totalorder %s979_s8, %s697_s22  ;;  %p701_p6 = scmp.lt.u32.totalorder %s697_s22, %s979_s8 }
 0x1c5   :  { %p703_p7 = pnand %p701_p6, %p698_p5 }
 0x1c7   :  { %706 = shalt.err (!%p703_p7)
}
 0x1c8   :  { %560 = dma.vmem_to_hbm [thread:$0]  %s558_s18, 64, %s979_s8, [#allocation5]  }
 0x1c9   :  { %707 = dma.done.wait [#allocation5], 64  }
 0x1ca   :  { %708 = vsyncadd [#allocation5], 4294967232 }
 0x1cb   :  { %564 = vsyncpa [#allocation5], 1 }

</bundles_post_ra>
